<compile_context>
chip_gen: v7x
topology: tpu7x:2x2x1
jax: 0.10.0
libtpu: 0.0.40
codegen_flags: <defaults>
</compile_context>

<pallas_src>
import functools

import jax
import jax.numpy as jnp
from jax.experimental import pallas as pl
from jax.experimental.pallas import tpu as pltpu

_LANES = 128
_TWO_PI = 6.283185307179586
_INV_2_23 = 1.0 / 8388608.0          # 2**-23


def _round_up(v, m):
    return (v + m - 1) // m * m


def _hash32(x):
    """lowbias32 integer hash (good avalanche on sequential keys, pure VPU ops)."""
    x = x ^ (x >> 16)
    x = x * jnp.uint32(0x7FEB352D)
    x = x ^ (x >> 15)
    x = x * jnp.uint32(0x846CA68B)
    x = x ^ (x >> 16)
    return x


def _bits_to_unit(h):
    """Top 23 bits of a uint32 -> float32 uniform in [0, 1)."""
    m = (h >> 9).astype(jnp.int32)    # < 2**23, exact and non-negative in int32
    return m.astype(jnp.float32) * _INV_2_23


def _cos_2pi(u):
    """cos(2*pi*u) for u in [0, 1) via an even Taylor polynomial (mul/add only)."""
    t = (u - 0.5) * _TWO_PI           # t in [-pi, pi);  cos(2*pi*u) == -cos(t)
    t2 = t * t
    p = jnp.float32(-1.1470746e-11)
    p = p * t2 + jnp.float32(2.0876757e-09)
    p = p * t2 + jnp.float32(-2.7557319e-07)
    p = p * t2 + jnp.float32(2.4801587e-05)
    p = p * t2 + jnp.float32(-1.3888889e-03)
    p = p * t2 + jnp.float32(4.1666668e-02)
    p = p * t2 + jnp.float32(-0.5)
    p = p * t2 + jnp.float32(1.0)
    return -p


def _gaussian_noise_kernel(seed_ref, x_ref, o_ref):
    shape = x_ref.shape
    rows_per_block = shape[0]
    # Globally unique per-element counter -> noise is invariant to the tiling.
    row = jax.lax.broadcasted_iota(jnp.int32, shape, 0)
    lane = jax.lax.broadcasted_iota(jnp.int32, shape, 1)
    idx = ((pl.program_id(0) * rows_per_block + row) * _LANES + lane)
    idx = idx.astype(jnp.uint32)
    seed = seed_ref[0].astype(jnp.uint32)
    # Two decorrelated counter-based streams, generated entirely on-chip.
    h1 = _hash32(idx ^ (seed * jnp.uint32(0x9E3779B9) + jnp.uint32(0x85EBCA6B)))
    h2 = _hash32(idx ^ (seed * jnp.uint32(0xC2B2AE35) + jnp.uint32(0x27D4EB2F)))
    u1 = 1.0 - _bits_to_unit(h1)      # (0, 1]  -> safe for log
    u2 = _bits_to_unit(h2)            # [0, 1)
    # Box-Muller: z ~ N(0, 1).  log/sqrt hit the EUP; the cosine is VPU polynomial.
    z = jnp.sqrt(-2.0 * jnp.log(u1)) * _cos_2pi(u2)
    o_ref[...] = (x_ref[...].astype(jnp.float32) + z).astype(o_ref.dtype)


def _add_gaussian_noise(x, seed, *, max_block_rows=2048):
    """y = x + N(0,1) noise, generated in-kernel.  Works for any x shape."""
    shape, dtype = x.shape, x.dtype
    n = x.size
    rows = pl.cdiv(n, _LANES)
    br = min(max_block_rows, _round_up(rows, 8))          # sublane-aligned tile
    rows_p = _round_up(rows, br)
    # Lane-dense 2D slab; a 2048x128 f32 tile is 1 MiB/buffer, so in+out
    # double-buffered is ~4 MiB: comfortably inside scoped VMEM on v5e/v6e/v7x.
    xp = jnp.pad(x.reshape(-1), (0, rows_p * _LANES - n)).reshape(rows_p, _LANES)

    out = pl.pallas_call(
        _gaussian_noise_kernel,
        out_shape=jax.ShapeDtypeStruct((rows_p, _LANES), dtype),
        grid_spec=pltpu.PrefetchScalarGridSpec(
            num_scalar_prefetch=1,                        # seed lives in SMEM
            grid=(rows_p // br,),
            in_specs=[pl.BlockSpec((br, _LANES), lambda i, seed: (i, 0))],
            out_specs=pl.BlockSpec((br, _LANES), lambda i, seed: (i, 0)),
        ),
        compiler_params=pltpu.CompilerParams(
            dimension_semantics=("parallel",),            # blocks independent
        ),
    )(seed, xp)
    return out.reshape(-1)[:n].reshape(shape)


@functools.partial(jax.jit, static_argnames=("training",))
def gaussian_noise_layer(x, seed, training=True):
    """Pallas equivalent of GaussianNoiseLayer.forward."""
    # TODO(synk): PyTorch's `self.training` flag / `.cuda(x.get_device())`
    # device pinning are host-side module state; modelled as a static kwarg.
    if not training:
        return x
    return _add_gaussian_noise(x, seed)


if __name__ == "__main__":
    key = jax.random.PRNGKey(0)
    kx, ks = jax.random.split(key)

    x = jax.random.normal(kx, (2, 4, 16, 16), jnp.float32)      # NCHW, small
    seed = jax.random.randint(ks, (1,), 0, 2**31 - 1, dtype=jnp.int32)

    y_train = gaussian_noise_layer(x, seed, training=True)
    y_eval = gaussian_noise_layer(x, seed, training=False)
    jax.block_until_ready((y_train, y_eval))

    assert y_train.shape == x.shape and y_train.dtype == x.dtype
    assert bool(jnp.all(jnp.isfinite(y_train)))
    # Eval mode is the identity.
    assert bool(jnp.all(y_eval == x))
    # Training mode: residual should look like N(0, 1) (2048 samples).
    noise = (y_train - x).reshape(-1)
    mean = float(jnp.mean(noise))
    std = float(jnp.std(noise))
    assert abs(mean) < 0.15 and abs(std - 1.0) < 0.15, (mean, std)

    print("KERNEL_OK")
</pallas_src>

<mosaic_0001>
module attributes {stable_mosaic.version = 11 : i64} {
  func.func @_gaussian_noise_kernel(%arg0: i32, %arg1: memref<1xi32, #tpu.memory_space<smem>>, %arg2: memref<16x128xf32, #tpu.memory_space<vmem>>, %arg3: memref<16x128xf32, #tpu.memory_space<vmem>>) attributes {dimension_semantics = [#tpu.dimension_semantics<parallel>], iteration_bounds = array<i64: 1>, scalar_prefetch = 1 : i64, scratch_operands = 0 : i64, tpu.core_type = #tpu.core_type<tc>, window_params = [{transform_indices = @transform_0, window_bounds = array<i64: 16, 128>}, {transform_indices = @transform_1, window_bounds = array<i64: 16, 128>}]} {
    %0 = tpu.iota {dimensions = array<i32: 0>} : vector<16x128xi32>
    %1 = tpu.iota {dimensions = array<i32: 1>} : vector<16x128xi32>
    %c16_i32 = arith.constant 16 : i32
    %2 = arith.muli %arg0, %c16_i32 : i32
    %3 = vector.broadcast %2 : i32 to vector<16x128xi32>
    %4 = arith.addi %3, %0 : vector<16x128xi32>
    %c128_i32 = arith.constant 128 : i32
    %5 = vector.broadcast %c128_i32 : i32 to vector<16x128xi32>
    %6 = arith.muli %4, %5 : vector<16x128xi32>
    %7 = arith.addi %6, %1 : vector<16x128xi32>
    %c0 = arith.constant 0 : index
    %8 = memref.load %arg1[%c0] : memref<1xi32, #tpu.memory_space<smem>>
    %c-1640531527_i32 = arith.constant -1640531527 : i32
    %9 = arith.muli %8, %c-1640531527_i32 : i32
    %c-2048144789_i32 = arith.constant -2048144789 : i32
    %10 = arith.addi %9, %c-2048144789_i32 : i32
    %11 = vector.broadcast %10 : i32 to vector<16x128xi32>
    %12 = arith.xori %7, %11 : vector<16x128xi32>
    %c16_i32_0 = arith.constant 16 : i32
    %13 = vector.broadcast %c16_i32_0 : i32 to vector<16x128xi32>
    %14 = arith.shrui %12, %13 : vector<16x128xi32>
    %15 = arith.xori %12, %14 : vector<16x128xi32>
    %c2146121005_i32 = arith.constant 2146121005 : i32
    %16 = vector.broadcast %c2146121005_i32 : i32 to vector<16x128xi32>
    %17 = arith.muli %15, %16 : vector<16x128xi32>
    %c15_i32 = arith.constant 15 : i32
    %18 = vector.broadcast %c15_i32 : i32 to vector<16x128xi32>
    %19 = arith.shrui %17, %18 : vector<16x128xi32>
    %20 = arith.xori %17, %19 : vector<16x128xi32>
    %c-2073254261_i32 = arith.constant -2073254261 : i32
    %21 = vector.broadcast %c-2073254261_i32 : i32 to vector<16x128xi32>
    %22 = arith.muli %20, %21 : vector<16x128xi32>
    %c16_i32_1 = arith.constant 16 : i32
    %23 = vector.broadcast %c16_i32_1 : i32 to vector<16x128xi32>
    %24 = arith.shrui %22, %23 : vector<16x128xi32>
    %25 = arith.xori %22, %24 : vector<16x128xi32>
    %c-1028477387_i32 = arith.constant -1028477387 : i32
    %26 = arith.muli %8, %c-1028477387_i32 : i32
    %c668265263_i32 = arith.constant 668265263 : i32
    %27 = arith.addi %26, %c668265263_i32 : i32
    %28 = vector.broadcast %27 : i32 to vector<16x128xi32>
    %29 = arith.xori %7, %28 : vector<16x128xi32>
    %c16_i32_2 = arith.constant 16 : i32
    %30 = vector.broadcast %c16_i32_2 : i32 to vector<16x128xi32>
    %31 = arith.shrui %29, %30 : vector<16x128xi32>
    %32 = arith.xori %29, %31 : vector<16x128xi32>
    %c2146121005_i32_3 = arith.constant 2146121005 : i32
    %33 = vector.broadcast %c2146121005_i32_3 : i32 to vector<16x128xi32>
    %34 = arith.muli %32, %33 : vector<16x128xi32>
    %c15_i32_4 = arith.constant 15 : i32
    %35 = vector.broadcast %c15_i32_4 : i32 to vector<16x128xi32>
    %36 = arith.shrui %34, %35 : vector<16x128xi32>
    %37 = arith.xori %34, %36 : vector<16x128xi32>
    %c-2073254261_i32_5 = arith.constant -2073254261 : i32
    %38 = vector.broadcast %c-2073254261_i32_5 : i32 to vector<16x128xi32>
    %39 = arith.muli %37, %38 : vector<16x128xi32>
    %c16_i32_6 = arith.constant 16 : i32
    %40 = vector.broadcast %c16_i32_6 : i32 to vector<16x128xi32>
    %41 = arith.shrui %39, %40 : vector<16x128xi32>
    %42 = arith.xori %39, %41 : vector<16x128xi32>
    %c9_i32 = arith.constant 9 : i32
    %43 = vector.broadcast %c9_i32 : i32 to vector<16x128xi32>
    %44 = arith.shrui %25, %43 : vector<16x128xi32>
    %45 = arith.sitofp %44 : vector<16x128xi32> to vector<16x128xf32>
    %cst = arith.constant 1.1920929E-7 : f32
    %46 = vector.broadcast %cst : f32 to vector<16x128xf32>
    %47 = arith.mulf %45, %46 : vector<16x128xf32>
    %cst_7 = arith.constant 1.000000e+00 : f32
    %48 = vector.broadcast %cst_7 : f32 to vector<16x128xf32>
    %49 = arith.subf %48, %47 : vector<16x128xf32>
    %c9_i32_8 = arith.constant 9 : i32
    %50 = vector.broadcast %c9_i32_8 : i32 to vector<16x128xi32>
    %51 = arith.shrui %42, %50 : vector<16x128xi32>
    %52 = arith.sitofp %51 : vector<16x128xi32> to vector<16x128xf32>
    %cst_9 = arith.constant 1.1920929E-7 : f32
    %53 = vector.broadcast %cst_9 : f32 to vector<16x128xf32>
    %54 = arith.mulf %52, %53 : vector<16x128xf32>
    %55 = math.log %49 : vector<16x128xf32>
    %cst_10 = arith.constant -2.000000e+00 : f32
    %56 = vector.broadcast %cst_10 : f32 to vector<16x128xf32>
    %57 = arith.mulf %56, %55 : vector<16x128xf32>
    %58 = math.sqrt %57 : vector<16x128xf32>
    %cst_11 = arith.constant 5.000000e-01 : f32
    %59 = vector.broadcast %cst_11 : f32 to vector<16x128xf32>
    %60 = arith.subf %54, %59 : vector<16x128xf32>
    %cst_12 = arith.constant 6.28318548 : f32
    %61 = vector.broadcast %cst_12 : f32 to vector<16x128xf32>
    %62 = arith.mulf %60, %61 : vector<16x128xf32>
    %63 = arith.mulf %62, %62 : vector<16x128xf32>
    %cst_13 = arith.constant -1.14707462E-11 : f32
    %64 = vector.broadcast %cst_13 : f32 to vector<16x128xf32>
    %65 = arith.mulf %64, %63 : vector<16x128xf32>
    %cst_14 = arith.constant 2.08767581E-9 : f32
    %66 = vector.broadcast %cst_14 : f32 to vector<16x128xf32>
    %67 = arith.addf %65, %66 : vector<16x128xf32>
    %68 = arith.mulf %67, %63 : vector<16x128xf32>
    %cst_15 = arith.constant -2.755732E-7 : f32
    %69 = vector.broadcast %cst_15 : f32 to vector<16x128xf32>
    %70 = arith.addf %68, %69 : vector<16x128xf32>
    %71 = arith.mulf %70, %63 : vector<16x128xf32>
    %cst_16 = arith.constant 2.48015876E-5 : f32
    %72 = vector.broadcast %cst_16 : f32 to vector<16x128xf32>
    %73 = arith.addf %71, %72 : vector<16x128xf32>
    %74 = arith.mulf %73, %63 : vector<16x128xf32>
    %cst_17 = arith.constant -0.00138888892 : f32
    %75 = vector.broadcast %cst_17 : f32 to vector<16x128xf32>
    %76 = arith.addf %74, %75 : vector<16x128xf32>
    %77 = arith.mulf %76, %63 : vector<16x128xf32>
    %cst_18 = arith.constant 0.0416666679 : f32
    %78 = vector.broadcast %cst_18 : f32 to vector<16x128xf32>
    %79 = arith.addf %77, %78 : vector<16x128xf32>
    %80 = arith.mulf %79, %63 : vector<16x128xf32>
    %cst_19 = arith.constant -5.000000e-01 : f32
    %81 = vector.broadcast %cst_19 : f32 to vector<16x128xf32>
    %82 = arith.addf %80, %81 : vector<16x128xf32>
    %83 = arith.mulf %82, %63 : vector<16x128xf32>
    %cst_20 = arith.constant 1.000000e+00 : f32
    %84 = vector.broadcast %cst_20 : f32 to vector<16x128xf32>
    %85 = arith.addf %83, %84 : vector<16x128xf32>
    %cst_21 = arith.constant 0.000000e+00 : f32
    %86 = vector.broadcast %cst_21 : f32 to vector<16x128xf32>
    %87 = arith.subf %86, %85 : vector<16x128xf32>
    %88 = arith.mulf %58, %87 : vector<16x128xf32>
    %c0_22 = arith.constant 0 : index
    %c0_23 = arith.constant 0 : index
    %89 = vector.load %arg2[%c0_22, %c0_23] : memref<16x128xf32, #tpu.memory_space<vmem>>, vector<16x128xf32>
    %90 = arith.addf %89, %88 : vector<16x128xf32>
    %c0_24 = arith.constant 0 : index
    %c0_25 = arith.constant 0 : index
    %91 = vector.load %arg3[%c0_24, %c0_25] : memref<16x128xf32, #tpu.memory_space<vmem>>, vector<16x128xf32>
    tpu.vector_store %arg3[%c0_24, %c0_25], %90 {strides = array<i32>} : memref<16x128xf32, #tpu.memory_space<vmem>>, vector<16x128xf32>,
    return
  }
  func.func @transform_0(%arg0: i32, %arg1: memref<1xi32, #tpu.memory_space<smem>>) -> (i32, i32) {
    %c0_i32 = arith.constant 0 : i32
    %c0_i32_0 = arith.constant 0 : i32
    return %arg0, %c0_i32 : i32, i32
  }
  func.func @transform_1(%arg0: i32, %arg1: memref<1xi32, #tpu.memory_space<smem>>) -> (i32, i32) {
    %c0_i32 = arith.constant 0 : i32
    %c0_i32_0 = arith.constant 0 : i32
    return %arg0, %c0_i32 : i32, i32
  }
}

</mosaic_0001>

<bundles_post_ra>
// kernel: gaussian_noise_layer.1
= control target key start
LH: loop header
LB: loop body
LE: loop exit
PB: predicated region body
PF: predicated region fallthrough
CT: control target
= control target key end

     0   :  { %v10_v0 = vlaneseq  ;;  %s191_s0 = inlined_call_operand.<no memory space> [shape: s32[1], index: 0, kind: input, shape index: {}]   ;;  %s192_s1 = inlined_call_operand.vmem [shape: f32[16,128], index: 1, kind: input, shape index: {}]   ;;  %s193_s2 = inlined_call_operand.vmem [shape: f32[16,128], index: 2, kind: output, shape index: {}]  }
   0x1   :  { %s24_s11 = smul.u32 2654435769, %s191_s0 }
   0x2   :  { %v11_v1 = vshrl.u32 %v10_v0, 7  ;;  %v14_v2 = vand.u32 127, %v10_v0  ;;  %s45_s14 = smul.u32 3266489909, %s191_s0 }
   0x3   :  { %s25_s15 = sadd.s32 2246822507, %s24_s11 }
   0x4   :  { %v12_v3 = vadd.s32 8, %v11_v1  ;;  %v19_v4 = vmul.u32 128, %v11_v1  ;;  %s46_s16 = sadd.s32 668265263, %s45_s14  ;;  %v26_v5 = vstv %s25_s15 }
   0x5   :  { %v47_v6 = vstv %s46_s16 }
   0x6   :  { %v20_v7 = vmul.u32 128, %v12_v3  ;;  %v21_v8 = vadd.s32 %v19_v4, %v14_v2 }
   0x8   :  { %v22_v9 = vadd.s32 %v20_v7, %v14_v2  ;;  %v27_v10 = vxor.u32 %v26_v5, %v21_v8  ;;  %v48_v11 = vxor.u32 %v47_v6, %v21_v8 }
   0xa   :  { %v28_v12 = vxor.u32 %v26_v5, %v22_v9  ;;  %v29_v13 = vshrl.u32 %v27_v10, 16  ;;  %v49_v14 = vxor.u32 %v47_v6, %v22_v9  ;;  %v50_v15 = vshrl.u32 %v48_v11, 16 }
   0xc   :  { %v30_v16 = vshrl.u32 %v28_v12, 16  ;;  %v31_v17 = vxor.u32 %v29_v13, %v27_v10  ;;  %v51_v18 = vshrl.u32 %v49_v14, 16  ;;  %v52_v19 = vxor.u32 %v50_v15, %v48_v11 }
   0xe   :  { %v32_v20 = vxor.u32 %v30_v16, %v28_v12  ;;  %v33_v21 = vmul.u32 2146121005, %v31_v17  ;;  %v53_v22 = vxor.u32 %v51_v18, %v49_v14  ;;  %v54_v23 = vmul.u32 2146121005, %v52_v19 }
  0x10   :  { %v34_v24 = vmul.u32 2146121005, %v32_v20  ;;  %v35_v25 = vshrl.u32 %v33_v21, 15  ;;  %v55_v26 = vmul.u32 2146121005, %v53_v22  ;;  %v56_v27 = vshrl.u32 %v54_v23, 15 }
  0x12   :  { %v36_v28 = vshrl.u32 %v34_v24, 15  ;;  %v37_v29 = vxor.u32 %v35_v25, %v33_v21  ;;  %v57_v30 = vshrl.u32 %v55_v26, 15  ;;  %v58_v31 = vxor.u32 %v56_v27, %v54_v23 }
  0x14   :  { %v38_v32 = vxor.u32 %v36_v28, %v34_v24  ;;  %v39_v33 = vmul.u32 2221713035, %v37_v29  ;;  %v59_v34 = vxor.u32 %v57_v30, %v55_v26  ;;  %v60_v35 = vmul.u32 2221713035, %v58_v31 }
  0x16   :  { %v40_v36 = vmul.u32 2221713035, %v38_v32  ;;  %v41_v37 = vshrl.u32 %v39_v33, 16  ;;  %v61_v38 = vmul.u32 2221713035, %v59_v34  ;;  %v62_v39 = vshrl.u32 %v60_v35, 16 }
  0x18   :  { %v42_v40 = vshrl.u32 %v40_v36, 16  ;;  %v43_v41 = vxor.u32 %v41_v37, %v39_v33  ;;  %v63_v42 = vshrl.u32 %v61_v38, 16  ;;  %v64_v43 = vxor.u32 %v62_v39, %v60_v35 }
  0x1a   :  { %v44_v44 = vxor.u32 %v42_v40, %v40_v36  ;;  %v65_v45 = vxor.u32 %v63_v42, %v61_v38  ;;  %v66_v46 = vshrl.u32 %v43_v41, 9  ;;  %v74_v47 = vshrl.u32 %v64_v43, 9 }
  0x1c   :  { %v67_v48 = vshrl.u32 %v44_v44, 9  ;;  %v68_v49 = vcvt.s32.f32 %v66_v46  ;;  %v75_v50 = vshrl.u32 %v65_v45, 9  ;;  %v76_v51 = vcvt.s32.f32 %v74_v47  ;;  %v138_v47 = vld [vmem:[%s192_s1] sm:$0xff] }
  0x1e   :  { %v69_v52 = vcvt.s32.f32 %v67_v48  ;;  %v70_v53 = vmul.f32 1.1920929e-07, %v68_v49  ;;  %v77_v54 = vcvt.s32.f32 %v75_v50  ;;  %v78_v55 = vmul.f32 1.1920929e-07, %v76_v51  ;;  %v139_v50 = vld [vmem:[%s192_s1 + $0x8] sm:$0xff] }
  0x20   :  { %v71_v56 = vmul.f32 1.1920929e-07, %v69_v52  ;;  %v72_v57 = vsub.f32 1.0, %v70_v53  ;;  %v79_v58 = vmul.f32 1.1920929e-07, %v77_v54  ;;  %v148_v59 = vadd.f32 -0.5, %v78_v55 }
  0x22   :  { %v73_v60 = vsub.f32 1.0, %v71_v56  ;;  %150 = vlog2.f32 %v72_v57  ;;  %v149_v61 = vadd.f32 -0.5, %v79_v58  ;;  %v102_v62 = vmul.f32 6.2831855, %v148_v59 }
  0x24   :  { %152 = vlog2.f32 %v73_v60  ;;  %v103_v63 = vmul.f32 6.2831855, %v149_v61  ;;  %v104_v0 = vmul.f32 %v102_v62, %v102_v62 }
  0x26   :  { %v105_v1 = vmul.f32 %v103_v63, %v103_v63  ;;  %v106_v2 = vmul.f32 -1.1470746e-11, %v104_v0 }
  0x28   :  { %v107_v3 = vmul.f32 -1.1470746e-11, %v105_v1  ;;  %v108_v4 = vadd.f32 2.0876758e-09, %v106_v2 }
  0x2a   :  { %v109_v5 = vadd.f32 2.0876758e-09, %v107_v3  ;;  %v110_v6 = vmul.f32 %v108_v4, %v104_v0 }
  0x2c   :  { %v151_v7 = vpop.eup %150  ;;  %v111_v8 = vmul.f32 %v109_v5, %v105_v1  ;;  %v112_v9 = vadd.f32 -2.755732e-07, %v110_v6 }
  0x2d   :  { %v81_v10 = vmul.f32 0.6931472, %v151_v7 }
  0x2e   :  { %v153_v11 = vpop.eup %152  ;;  %v113_v12 = vadd.f32 -2.755732e-07, %v111_v8  ;;  %v114_v13 = vmul.f32 %v112_v9, %v104_v0 }
  0x2f   :  { %v83_v14 = vmul.f32 0.6931472, %v153_v11  ;;  %v84_v15 = vmul.f32 -2.0, %v81_v10 }
  0x30   :  { %v115_v16 = vmul.f32 %v113_v12, %v105_v1  ;;  %v116_v17 = vadd.f32 2.4801588e-05, %v114_v13 }
  0x31   :  { %v85_v18 = vmul.f32 -2.0, %v83_v14  ;;  %154 = vrsqrt.f32 %v84_v15  ;;  %vm88_vm0 = vcmp.eq.f32.partialorder %v84_v15, inf  ;;  %vm90_vm1 = vcmp.eq.f32.partialorder %v84_v15, 0.0 }
  0x32   :  { %v117_v19 = vadd.f32 2.4801588e-05, %v115_v16  ;;  %v118_v20 = vmul.f32 %v116_v17, %v104_v0  ;;  %v91_v34 = vand.u32 2147483648, %v84_v15 }
  0x33   :  { %156 = vrsqrt.f32 %v85_v18  ;;  %vm95_vm2 = vcmp.eq.f32.partialorder %v85_v18, inf  ;;  %v98_v39 = vand.u32 2147483648, %v85_v18  ;;  %vm97_vm3 = vcmp.eq.f32.partialorder %v85_v18, 0.0 }
  0x34   :  { %v119_v21 = vmul.f32 %v117_v19, %v105_v1  ;;  %v120_v22 = vadd.f32 -0.0013888889, %v118_v20 }
  0x36   :  { %v121_v23 = vadd.f32 -0.0013888889, %v119_v21  ;;  %v122_v24 = vmul.f32 %v120_v22, %v104_v0 }
  0x38   :  { %v123_v25 = vmul.f32 %v121_v23, %v105_v1  ;;  %v124_v26 = vadd.f32 0.041666668, %v122_v24 }
  0x3a   :  { %v125_v27 = vadd.f32 0.041666668, %v123_v25  ;;  %v126_v28 = vmul.f32 %v124_v26, %v104_v0 }
  0x3b   :  { %v155_v29 = vpop.eup %154 }
  0x3c   :  { %v87_v30 = vmul.f32 %v155_v29, %v84_v15  ;;  %v127_v31 = vmul.f32 %v125_v27, %v105_v1  ;;  %v128_v32 = vadd.f32 -0.5, %v126_v28 }
  0x3d   :  { %v157_v33 = vpop.eup %156 }
  0x3e   :  { %v89_v35 = vsel %vm88_vm0, %v84_v15, %v87_v30  ;;  %v94_v36 = vmul.f32 %v157_v33, %v85_v18  ;;  %v129_v37 = vadd.f32 -0.5, %v127_v31  ;;  %v130_v38 = vmul.f32 %v128_v32, %v104_v0 }
  0x3f   :  { %v92_v43 = vsel %vm90_vm1, %v91_v34, %v89_v35 }
  0x40   :  { %v96_v40 = vsel %vm95_vm2, %v85_v18, %v94_v36  ;;  %v131_v41 = vmul.f32 %v129_v37, %v105_v1  ;;  %v132_v42 = vadd.f32 1.0, %v130_v38 }
  0x41   :  { %v99_v46 = vsel %vm97_vm3, %v98_v39, %v96_v40 }
  0x42   :  { %v133_v44 = vadd.f32 1.0, %v131_v41  ;;  %v134_v45 = vsub.f32 0.0, %v132_v42 }
  0x44   :  { %v135_v48 = vsub.f32 0.0, %v133_v44  ;;  %v136_v49 = vmul.f32 %v134_v45, %v92_v43 }
  0x46   :  { %v137_v51 = vmul.f32 %v135_v48, %v99_v46  ;;  %v140_v52 = vadd.f32 %v138_v47, %v136_v49 }
  0x48   :  { %v141_v53 = vadd.f32 %v139_v50, %v137_v51  ;;  %142 = vst [vmem:[%s193_s2] sm:$0xff] %v140_v52 }
  0x4a   :  { %143 = vst [vmem:[%s193_s2 + $0x8] sm:$0xff] %v141_v53 }

</bundles_post_ra>
